<compile_context>
chip_gen: v7x
topology: tpu7x:2x2x1
jax: 0.10.0
libtpu: 0.0.40
codegen_flags: <defaults>
</compile_context>

<pallas_src>
import math

import jax
import jax.numpy as jnp
from jax.experimental import pallas as pl
from jax.experimental.pallas import tpu as pltpu


def _round_up(x, m):
    return (x + m - 1) // m * m


# ---------------------------------------------------------------------------
# "init": build the sinusoidal positional-encoding buffer (torch __init__)
# ---------------------------------------------------------------------------

def make_positional_encoding(d_model, max_len=5000, dtype=jnp.float32):
    """Replicates the torch buffer exactly: shape (max_len, 1, d_model)."""
    position = jnp.arange(max_len, dtype=jnp.float32)[:, None]            # (L, 1)
    div_term = jnp.exp(jnp.arange(0, d_model, 2, dtype=jnp.float32)
                       * (-math.log(10000.0) / d_model))                  # (D/2,)
    pe = jnp.zeros((max_len, d_model), jnp.float32)
    pe = pe.at[:, 0::2].set(jnp.sin(position * div_term))
    pe = pe.at[:, 1::2].set(jnp.cos(position * div_term))
    # unsqueeze(0).transpose(0, 1)  ->  (max_len, 1, d_model)
    return pe[:, None, :].astype(dtype)


# ---------------------------------------------------------------------------
# Pallas forward kernel: out = x + pe[:S]   (broadcast over batch)
# ---------------------------------------------------------------------------

def _pe_add_kernel(x_ref, pe_ref, o_ref):
    # x_ref: (TS, B, D), pe_ref: (TS, 1, D) -> sublane broadcast over batch.
    o_ref[...] = x_ref[...] + pe_ref[...].astype(x_ref.dtype)


def positional_encoding_forward(x, pe):
    """x: (S, B, D), pe: (max_len, 1, D)  ->  x + pe[:S]  (same shape/dtype)."""
    s, b, d = x.shape
    assert pe.shape[1] == 1 and pe.shape[2] == d
    assert s <= pe.shape[0], "sequence longer than max_len"

    # Sequence tile: as large as ~2 MiB of VMEM per x block allows (mem-bound
    # kernel — bigger tiles amortize per-grid-step overhead), capped at S.
    bytes_per_row = b * d * x.dtype.itemsize
    ts = max(1, min(s, (2 << 20) // max(1, bytes_per_row)))
    sp = _round_up(s, ts)

    x_p = jnp.pad(x, ((0, sp - s), (0, 0), (0, 0))) if sp != s else x
    pe_s = pe[:s]
    pe_p = jnp.pad(pe_s, ((0, sp - s), (0, 0), (0, 0))) if sp != s else pe_s

    out = pl.pallas_call(
        _pe_add_kernel,
        out_shape=jax.ShapeDtypeStruct((sp, b, d), x.dtype),
        grid_spec=pltpu.PrefetchScalarGridSpec(
            num_scalar_prefetch=0,
            grid=(sp // ts,),
            in_specs=[
                pl.BlockSpec((ts, b, d), lambda i: (i, 0, 0)),
                pl.BlockSpec((ts, 1, d), lambda i: (i, 0, 0)),
            ],
            out_specs=pl.BlockSpec((ts, b, d), lambda i: (i, 0, 0)),
        ),
        compiler_params=pltpu.CompilerParams(
            dimension_semantics=("parallel",)),
    )(x_p, pe_p)
    return out[:s]


if __name__ == "__main__":
    key = jax.random.PRNGKey(0)
    S, B, D = 8, 2, 128          # (seq, batch, d_model)
    MAX_LEN = 32

    x = jax.random.normal(key, (S, B, D), jnp.float32)
    pe = make_positional_encoding(D, max_len=MAX_LEN)   # buffer, built once

    fwd = jax.jit(positional_encoding_forward)
    out = jax.block_until_ready(fwd(x, pe))

    assert out.shape == (S, B, D), out.shape
    assert out.dtype == jnp.float32
    ref = x + pe[:S]                                    # plain-JAX reference
    assert bool(jnp.all(jnp.isfinite(out)))
    assert bool(jnp.allclose(out, ref, atol=1e-6, rtol=1e-6))
    print("KERNEL_OK")
</pallas_src>

<mosaic_0001>
module attributes {stable_mosaic.version = 11 : i64} {
  func.func @_pe_add_kernel(%arg0: i32, %arg1: memref<8x2x128xf32, #tpu.memory_space<vmem>>, %arg2: memref<8x1x128xf32, #tpu.memory_space<vmem>>, %arg3: memref<8x2x128xf32, #tpu.memory_space<vmem>>) attributes {dimension_semantics = [#tpu.dimension_semantics<parallel>], iteration_bounds = array<i64: 1>, scalar_prefetch = 0 : i64, scratch_operands = 0 : i64, tpu.core_type = #tpu.core_type<tc>, window_params = [{transform_indices = @transform_0, window_bounds = array<i64: 8, 2, 128>}, {transform_indices = @transform_1, window_bounds = array<i64: 8, 1, 128>}, {transform_indices = @transform_2, window_bounds = array<i64: 8, 2, 128>}]} {
    %c0 = arith.constant 0 : index
    %c0_0 = arith.constant 0 : index
    %c0_1 = arith.constant 0 : index
    %0 = vector.load %arg1[%c0, %c0_0, %c0_1] : memref<8x2x128xf32, #tpu.memory_space<vmem>>, vector<8x2x128xf32>
    %c0_2 = arith.constant 0 : index
    %c0_3 = arith.constant 0 : index
    %c0_4 = arith.constant 0 : index
    %1 = vector.load %arg2[%c0_2, %c0_3, %c0_4] : memref<8x1x128xf32, #tpu.memory_space<vmem>>, vector<8x1x128xf32>
    %2 = vector.broadcast %1 : vector<8x1x128xf32> to vector<8x2x128xf32>
    %3 = arith.addf %0, %2 : vector<8x2x128xf32>
    %c0_5 = arith.constant 0 : index
    %c0_6 = arith.constant 0 : index
    %c0_7 = arith.constant 0 : index
    %4 = vector.load %arg3[%c0_5, %c0_6, %c0_7] : memref<8x2x128xf32, #tpu.memory_space<vmem>>, vector<8x2x128xf32>
    tpu.vector_store %arg3[%c0_5, %c0_6, %c0_7], %3 {strides = array<i32>} : memref<8x2x128xf32, #tpu.memory_space<vmem>>, vector<8x2x128xf32>,
    return
  }
  func.func @transform_0(%arg0: i32) -> (i32, i32, i32) {
    %c0_i32 = arith.constant 0 : i32
    %c0_i32_0 = arith.constant 0 : i32
    %c0_i32_1 = arith.constant 0 : i32
    return %arg0, %c0_i32, %c0_i32_0 : i32, i32, i32
  }
  func.func @transform_1(%arg0: i32) -> (i32, i32, i32) {
    %c0_i32 = arith.constant 0 : i32
    %c0_i32_0 = arith.constant 0 : i32
    %c0_i32_1 = arith.constant 0 : i32
    return %arg0, %c0_i32, %c0_i32_0 : i32, i32, i32
  }
  func.func @transform_2(%arg0: i32) -> (i32, i32, i32) {
    %c0_i32 = arith.constant 0 : i32
    %c0_i32_0 = arith.constant 0 : i32
    %c0_i32_1 = arith.constant 0 : i32
    return %arg0, %c0_i32, %c0_i32_0 : i32, i32, i32
  }
}

</mosaic_0001>

<bundles_post_ra>
// kernel: positional_encoding_forward.1
= control target key start
LH: loop header
LB: loop body
LE: loop exit
PB: predicated region body
PF: predicated region fallthrough
CT: control target
= control target key end

     0   :  { %7 = vsyncpa [#allocation3], 0  ;;  %s259_s0 = inlined_call_operand.hbm [shape: f32[8,2,128], index: 0, kind: input, shape index: {}]   ;;  %s260_s1 = inlined_call_operand.vmem [shape: f32[8,1,128], index: 1, kind: input, shape index: {}]   ;;  %s261_s2 = inlined_call_operand.hbm [shape: f32[8,2,128], index: 2, kind: output, shape index: {}]  }
   0x1   :  { %8 = vsyncpa [#allocation4], 0  ;;  %s183_s9 = smov [#allocation2]   ;;  %s135_s13 = scalar_lea.hbm %s259_s0, 256 }
   0x2   :  { %s14_s10 = sshll.u32 %s183_s9, 4  ;;  %p136_p0 = scmp.ne.s32.totalorder %s259_s0, %s135_s13  ;;  %s15_s10 = int_to_ptr.vmem [resolvable:$true] %s14_s10 }
   0x3   :  { %p139_p1 = scmp.lt.u32.totalorder %s135_s13, %s259_s0 }
   0x5   :  { %p141_p2 = pnand %p139_p1, %p136_p0 }
   0x7   :  { %144 = shalt.err (!%p141_p2)
}
   0x8   :  { %s145_s18 = scalar_lea.vmem %s15_s10, 256  ;;  %p150_p4 = scmp.lt.s32.totalorder %s15_s10, %s15_s10 }
   0x9   :  { %p146_p3 = scmp.ne.s32.totalorder %s15_s10, %s145_s18  ;;  %p151_p5 = scmp.lt.s32.totalorder %s145_s18, %s145_s18 }
   0xb   :  { %p152_p6 = por %p151_p5, %p150_p4 }
   0xd   :  { %p153_p7 = pnand %p152_p6, %p146_p3 }
   0xf   :  { %156 = shalt.err (!%p153_p7)
}
  0x10   :  { %s184_s19 = smov 32   ;;  %s185_s20 = smov 2  }
  0x11   :  { %20 = dma.hbm_to_vmem [thread:$0]  %s259_s0, 256, %s15_s10, [#allocation3], %s184_s19, %s184_s19, %s185_s20  }
  0x12   :  { %179 = dma.done.wait [#allocation3], 256  }
  0x13   :  { %180 = vsyncadd [#allocation3], 4294967040  ;;  %s186_s23 = smov [#allocation5]   ;;  %v26_v0 = vld [vmem:[#allocation2] sm:$0x3] }
  0x14   :  { %s217_s24 = sshll.u32 %s186_s23, 4  ;;  %v123_v1 = vld [vmem:[%s260_s1] ss:$0 sm:$0xff]  ;;  %v27_v2 = vld [vmem:[#allocation2 + $0x2] sm:$0x3]  ;;  %s112_s24 = int_to_ptr.vmem [resolvable:$true] %s217_s24 }
  0x15   :  { %v90_v3 = vadd.f32 %v123_v1, %v26_v0  ;;  %v124_v4 = vld [vmem:[%s260_s1 + $0x1] ss:$0 sm:$0xff]  ;;  %v28_v5 = vld [vmem:[#allocation2 + $0x4] sm:$0x3]  ;;  %v125_v6 = vld [vmem:[%s260_s1 + $0x2] ss:$0 sm:$0xff]  ;;  %p162_p9 = scmp.lt.s32.totalorder %s112_s24, %s112_s24 }
  0x16   :  { %v91_v7 = vadd.f32 %v124_v4, %v27_v2  ;;  %v92_v8 = vadd.f32 %v125_v6, %v28_v5  ;;  %v29_v9 = vld [vmem:[#allocation2 + $0x6] sm:$0x3]  ;;  %v126_v10 = vld [vmem:[%s260_s1 + $0x3] ss:$0 sm:$0xff]  ;;  %v30_v11 = vld [vmem:[#allocation2 + $0x8] sm:$0x3] }
  0x17   :  { %98 = vst [vmem:[#allocation5] sm:$0x3] %v90_v3  ;;  %v93_v12 = vadd.f32 %v126_v10, %v29_v9  ;;  %v127_v13 = vld [vmem:[%s260_s1 + $0x4] ss:$0 sm:$0xff]  ;;  %v31_v14 = vld [vmem:[#allocation2 + $0xa] sm:$0x3] }
  0x18   :  { %v128_v15 = vld [vmem:[%s260_s1 + $0x5] ss:$0 sm:$0xff]  ;;  %99 = vst [vmem:[#allocation5 + $0x2] sm:$0x3] %v91_v7  ;;  %100 = vst [vmem:[#allocation5 + $0x4] sm:$0x3] %v92_v8  ;;  %v94_v16 = vadd.f32 %v127_v13, %v30_v11 }
  0x19   :  { %v95_v17 = vadd.f32 %v128_v15, %v31_v14  ;;  %v32_v18 = vld [vmem:[#allocation2 + $0xc] sm:$0x3]  ;;  %v129_v19 = vld [vmem:[%s260_s1 + $0x6] ss:$0 sm:$0xff]  ;;  %v33_v20 = vld [vmem:[#allocation2 + $0xe] sm:$0x3] }
  0x1a   :  { %101 = vst [vmem:[#allocation5 + $0x6] sm:$0x3] %v93_v12  ;;  %v96_v21 = vadd.f32 %v129_v19, %v32_v18  ;;  %v130_v22 = vld [vmem:[%s260_s1 + $0x7] ss:$0 sm:$0xff]  ;;  %102 = vst [vmem:[#allocation5 + $0x8] sm:$0x3] %v94_v16 }
  0x1b   :  { %103 = vst [vmem:[#allocation5 + $0xa] sm:$0x3] %v95_v17  ;;  %v97_v23 = vadd.f32 %v130_v22, %v33_v20  ;;  %s157_s12 = scalar_lea.vmem %s112_s24, 256 }
  0x1c   :  { %104 = vst [vmem:[#allocation5 + $0xc] sm:$0x3] %v96_v21  ;;  %p158_p8 = scmp.ne.s32.totalorder %s112_s24, %s157_s12  ;;  %p163_p10 = scmp.lt.s32.totalorder %s157_s12, %s157_s12 }
  0x1d   :  { %105 = vst [vmem:[#allocation5 + $0xe] sm:$0x3] %v97_v23 }
  0x1e   :  { %p164_p11 = por %p163_p10, %p162_p9 }
  0x20   :  { %p165_p12 = pnand %p164_p11, %p158_p8 }
  0x22   :  { %168 = shalt.err (!%p165_p12)
}
  0x23   :  { %s169_s15 = scalar_lea.hbm %s261_s2, 256 }
  0x24   :  { %p170_p13 = scmp.ne.s32.totalorder %s261_s2, %s169_s15  ;;  %p173_p0 = scmp.lt.u32.totalorder %s169_s15, %s261_s2 }
  0x26   :  { %p175_p1 = pnand %p173_p0, %p170_p13 }
  0x28   :  { %178 = shalt.err (!%p175_p1)
}
  0x29   :  { %117 = dma.vmem_to_hbm [thread:$0]  %s112_s24, 256, %s261_s2, [#allocation4], %s184_s19, %s184_s19, %s185_s20  }
  0x2a   :  { %181 = dma.done.wait [#allocation4], 256  }
  0x2b   :  { %182 = vsyncadd [#allocation4], 4294967040 }
  0x2c   :  { %121 = vsyncpa [#allocation3], 1 }
  0x2d   :  { %122 = vsyncpa [#allocation4], 1 }

</bundles_post_ra>
